<compile_context>
chip_gen: v7x
topology: tpu7x:2x2x1
jax: 0.10.0
libtpu: 0.0.40
codegen_flags: <defaults>
</compile_context>

<pallas_src>
import jax
import jax.numpy as jnp
from jax.experimental import pallas as pl
from jax.experimental.pallas import tpu as pltpu


def _round_up(x, m):
    return ((x + m - 1) // m) * m


def _fused_linear_residual_kernel(xv_ref, xp_ref, wv_ref, wp_ref,
                                  bv_ref, bp_ref, ov_ref, op_ref):
    # xv/xp: (TM, DP) input dtype      wv/wp: (DP, DP) input dtype
    # bv/bp: (1, DP)  f32              ov/op: (TM, DP) input dtype
    xv = xv_ref[...]
    xp = xp_ref[...]
    yv = jnp.dot(xv, wv_ref[...], preferred_element_type=jnp.float32)   # MXU
    yp = jnp.dot(xp, wp_ref[...], preferred_element_type=jnp.float32)   # MXU
    ov_ref[...] = (yv + bv_ref[...] + xv.astype(jnp.float32)).astype(ov_ref.dtype)
    op_ref[...] = (yp + bp_ref[...] + xp.astype(jnp.float32)).astype(op_ref.dtype)


def residual_forward(input_t, params, *, block_rows=1024, donate_inputs=False):
    """Pallas implementation of Residual.forward with fn = per-stream Linear.

    input_t = (value, pos, x_mask);  params = (w_val, b_val, w_pos, b_pos).
    `block_rows` counts PACKED rows (128-lane vectors) per grid step.
    `donate_inputs=True` aliases the packed value/pos buffers as outputs
    (only safe when the caller will not reuse them afterwards).
    """
    value, pos, x_mask = input_t
    w_val, b_val, w_pos, b_pos = params

    B, N, D = value.shape
    M = B * N
    dtype = value.dtype
    elt = jnp.dtype(dtype).itemsize

    # ---- lane packing -------------------------------------------------------
    # Fold P = 128 // D consecutive rows into one 128-lane vector (free reshape)
    # and matmul against blockdiag(W, ..., W).  Fallback: pad D up to 128k.
    if D <= 128 and 128 % D == 0:
        P, DP, pad_d = 128 // D, 128, 0
    else:
        P, DP = 1, _round_up(D, 128)
        pad_d = DP - D

    M_pad = _round_up(M, P)          # only the ragged row tail is ever padded
    rows = M_pad // P                # packed row count

    def prep_x(x):
        x2 = x.reshape(M, D)
        if pad_d or M_pad != M:      # only when shapes are not packing-friendly
            x2 = jnp.pad(x2, ((0, M_pad - M), (0, pad_d)))
        return x2.reshape(rows, DP)  # contiguous -> free reshape in the common case

    def prep_w(w):
        if P > 1:
            wbd = jnp.kron(jnp.eye(P, dtype=w.dtype), w)   # blockdiag(W,...,W)
        else:
            wbd = jnp.pad(w, ((0, pad_d), (0, pad_d)))
        return wbd.astype(dtype)     # tiny: (128, 128)

    def prep_b(b):
        bt = jnp.tile(b, P) if P > 1 else jnp.pad(b, (0, pad_d))
        return bt.reshape(1, DP).astype(jnp.float32)

    xv, xp = prep_x(value), prep_x(pos)
    wv, wp = prep_w(w_val), prep_w(w_pos)
    bv, bp = prep_b(b_val), prep_b(b_pos)

    # ---- tiling -------------------------------------------------------------
    if rows <= block_rows:
        TM = rows                                # single full-extent tile
    else:
        TM = max(8, (block_rows // 8) * 8)       # sublane multiple
    grid = (pl.cdiv(rows, TM),)                  # ragged last tile masked by Pallas

    x_tile_bytes = TM * DP * elt
    w_bytes = DP * DP * elt
    # double-buffered (in + out) x tiles for both streams + resident W/b
    tile_vmem = 2 * 2 * 2 * x_tile_bytes + 2 * 2 * (w_bytes + DP * 4)
    vmem_limit = min(2 * tile_vmem + (4 << 20), 48 << 20)   # margin, no big floor

    cost = pl.CostEstimate(
        flops=2 * 2 * rows * DP * DP,                                  # both streams
        transcendentals=0,
        bytes_accessed=4 * rows * DP * elt + 2 * w_bytes + 2 * DP * 4,  # x in/out, W, b
    )

    x_spec = pl.BlockSpec((TM, DP), lambda i: (i, 0))     # streamed over M
    w_spec = pl.BlockSpec((DP, DP), lambda i: (0, 0))     # VMEM-resident
    b_spec = pl.BlockSpec((1, DP), lambda i: (0, 0))      # VMEM-resident

    ov, op = pl.pallas_call(
        _fused_linear_residual_kernel,
        out_shape=(jax.ShapeDtypeStruct((rows, DP), dtype),
                   jax.ShapeDtypeStruct((rows, DP), dtype)),
        grid=grid,
        in_specs=[x_spec, x_spec, w_spec, w_spec, b_spec, b_spec],
        out_specs=(x_spec, x_spec),
        compiler_params=pltpu.CompilerParams(
            dimension_semantics=("parallel",),   # v7x: 2 TCs split the row range
            vmem_limit_bytes=vmem_limit,
        ),
        cost_estimate=cost,
        input_output_aliases=({0: 0, 1: 1} if donate_inputs else {}),
    )(xv, xp, wv, wp, bv, bp)

    def unpack(o):
        o2 = o.reshape(M_pad, D + pad_d)
        if pad_d or M_pad != M:
            o2 = o2[:M, :D]
        return o2.reshape(B, N, D)

    return unpack(ov), unpack(op), x_mask


if __name__ == "__main__":
    B, N, D = 2, 8, 32  # batch, seq, hidden

    key = jax.random.PRNGKey(0)
    k_val, k_pos, k_wv, k_wp, k_bv, k_bp, k_mask = jax.random.split(key, 7)

    value = jax.random.normal(k_val, (B, N, D), dtype=jnp.float32)
    pos = jax.random.normal(k_pos, (B, N, D), dtype=jnp.float32)
    x_mask = jax.random.uniform(k_mask, (B, N)) > 0.2

    # Deterministic parameters of the wrapped fn (linear projection per stream).
    scale = 1.0 / jnp.sqrt(D)
    w_val = jax.random.normal(k_wv, (D, D), dtype=jnp.float32) * scale
    b_val = jax.random.normal(k_bv, (D,), dtype=jnp.float32) * 0.1
    w_pos = jax.random.normal(k_wp, (D, D), dtype=jnp.float32) * scale
    b_pos = jax.random.normal(k_bp, (D,), dtype=jnp.float32) * 0.1

    out_val, out_pos, out_mask = residual_forward(
        (value, pos, x_mask), (w_val, b_val, w_pos, b_pos)
    )
    jax.block_until_ready(out_val)
    jax.block_until_ready(out_pos)

    # Pure-JAX reference: fn(x) + x  with fn = Linear(W, b).
    def ref(x, w, b):
        return jnp.einsum("bnd,de->bne", x, w) + b + x

    ref_val = ref(value, w_val, b_val)
    ref_pos = ref(pos, w_pos, b_pos)

    # Tolerance covers possible differences in default TPU f32-matmul precision
    # between Mosaic and XLA paths.
    assert jnp.allclose(out_val, ref_val, atol=2e-2, rtol=2e-2)
    assert jnp.allclose(out_pos, ref_pos, atol=2e-2, rtol=2e-2)
    assert jnp.array_equal(out_mask, x_mask)

    print("KERNEL_OK")
</pallas_src>

<mosaic_0001>
module attributes {stable_mosaic.version = 11 : i64} {
  func.func @_fused_linear_residual_kernel(%arg0: i32, %arg1: memref<4x128xf32, #tpu.memory_space<vmem>>, %arg2: memref<4x128xf32, #tpu.memory_space<vmem>>, %arg3: memref<128x128xf32, #tpu.memory_space<vmem>>, %arg4: memref<128x128xf32, #tpu.memory_space<vmem>>, %arg5: memref<1x128xf32, #tpu.memory_space<vmem>>, %arg6: memref<1x128xf32, #tpu.memory_space<vmem>>, %arg7: memref<4x128xf32, #tpu.memory_space<vmem>>, %arg8: memref<4x128xf32, #tpu.memory_space<vmem>>) attributes {dimension_semantics = [#tpu.dimension_semantics<parallel>], iteration_bounds = array<i64: 1>, scalar_prefetch = 0 : i64, scratch_operands = 0 : i64, tpu.core_type = #tpu.core_type<tc>, window_params = [{transform_indices = @transform_0, window_bounds = array<i64: 4, 128>}, {transform_indices = @transform_1, window_bounds = array<i64: 4, 128>}, {pipeline_mode = #tpu.pipeline_mode<synchronous>, transform_indices = @transform_2, window_bounds = array<i64: 128, 128>}, {pipeline_mode = #tpu.pipeline_mode<synchronous>, transform_indices = @transform_3, window_bounds = array<i64: 128, 128>}, {pipeline_mode = #tpu.pipeline_mode<synchronous>, transform_indices = @transform_4, window_bounds = array<i64: 1, 128>}, {pipeline_mode = #tpu.pipeline_mode<synchronous>, transform_indices = @transform_5, window_bounds = array<i64: 1, 128>}, {transform_indices = @transform_6, window_bounds = array<i64: 4, 128>}, {transform_indices = @transform_7, window_bounds = array<i64: 4, 128>}]} {
    %c0 = arith.constant 0 : index
    %c0_0 = arith.constant 0 : index
    %0 = vector.load %arg1[%c0, %c0_0] : memref<4x128xf32, #tpu.memory_space<vmem>>, vector<4x128xf32>
    %c0_1 = arith.constant 0 : index
    %c0_2 = arith.constant 0 : index
    %1 = vector.load %arg2[%c0_1, %c0_2] : memref<4x128xf32, #tpu.memory_space<vmem>>, vector<4x128xf32>
    %c0_3 = arith.constant 0 : index
    %c0_4 = arith.constant 0 : index
    %2 = vector.load %arg3[%c0_3, %c0_4] : memref<128x128xf32, #tpu.memory_space<vmem>>, vector<128x128xf32>
    %cst = arith.constant dense<0.000000e+00> : vector<4x128xf32>
    %3 = tpu.matmul %0, %2, %cst {dimension_numbers = #tpu.dot_dimension_numbers<[1], [0], [0], [1], [0, 0, 1, 1], [], []>} : vector<4x128xf32>, vector<128x128xf32>, vector<4x128xf32> -> vector<4x128xf32>
    %c0_5 = arith.constant 0 : index
    %c0_6 = arith.constant 0 : index
    %4 = vector.load %arg4[%c0_5, %c0_6] : memref<128x128xf32, #tpu.memory_space<vmem>>, vector<128x128xf32>
    %cst_7 = arith.constant dense<0.000000e+00> : vector<4x128xf32>
    %5 = tpu.matmul %1, %4, %cst_7 {dimension_numbers = #tpu.dot_dimension_numbers<[1], [0], [0], [1], [0, 0, 1, 1], [], []>} : vector<4x128xf32>, vector<128x128xf32>, vector<4x128xf32> -> vector<4x128xf32>
    %c0_8 = arith.constant 0 : index
    %c0_9 = arith.constant 0 : index
    %6 = vector.load %arg5[%c0_8, %c0_9] : memref<1x128xf32, #tpu.memory_space<vmem>>, vector<1x128xf32>
    %7 = vector.broadcast %6 : vector<1x128xf32> to vector<4x128xf32>
    %8 = arith.addf %3, %7 : vector<4x128xf32>
    %9 = arith.addf %8, %0 : vector<4x128xf32>
    %c0_10 = arith.constant 0 : index
    %c0_11 = arith.constant 0 : index
    %10 = vector.load %arg7[%c0_10, %c0_11] : memref<4x128xf32, #tpu.memory_space<vmem>>, vector<4x128xf32>
    tpu.vector_store %arg7[%c0_10, %c0_11], %9 {strides = array<i32>} : memref<4x128xf32, #tpu.memory_space<vmem>>, vector<4x128xf32>,
    %c0_12 = arith.constant 0 : index
    %c0_13 = arith.constant 0 : index
    %11 = vector.load %arg6[%c0_12, %c0_13] : memref<1x128xf32, #tpu.memory_space<vmem>>, vector<1x128xf32>
    %12 = vector.broadcast %11 : vector<1x128xf32> to vector<4x128xf32>
    %13 = arith.addf %5, %12 : vector<4x128xf32>
    %14 = arith.addf %13, %1 : vector<4x128xf32>
    %c0_14 = arith.constant 0 : index
    %c0_15 = arith.constant 0 : index
    %15 = vector.load %arg8[%c0_14, %c0_15] : memref<4x128xf32, #tpu.memory_space<vmem>>, vector<4x128xf32>
    tpu.vector_store %arg8[%c0_14, %c0_15], %14 {strides = array<i32>} : memref<4x128xf32, #tpu.memory_space<vmem>>, vector<4x128xf32>,
    return
  }
  func.func @transform_0(%arg0: i32) -> (i32, i32) {
    %c0_i32 = arith.constant 0 : i32
    %c0_i32_0 = arith.constant 0 : i32
    return %arg0, %c0_i32 : i32, i32
  }
  func.func @transform_1(%arg0: i32) -> (i32, i32) {
    %c0_i32 = arith.constant 0 : i32
    %c0_i32_0 = arith.constant 0 : i32
    return %arg0, %c0_i32 : i32, i32
  }
  func.func @transform_2(%arg0: i32) -> (i32, i32) {
    %c0_i32 = arith.constant 0 : i32
    %c0_i32_0 = arith.constant 0 : i32
    %c0_i32_1 = arith.constant 0 : i32
    return %c0_i32, %c0_i32_0 : i32, i32
  }
  func.func @transform_3(%arg0: i32) -> (i32, i32) {
    %c0_i32 = arith.constant 0 : i32
    %c0_i32_0 = arith.constant 0 : i32
    %c0_i32_1 = arith.constant 0 : i32
    return %c0_i32, %c0_i32_0 : i32, i32
  }
  func.func @transform_4(%arg0: i32) -> (i32, i32) {
    %c0_i32 = arith.constant 0 : i32
    %c0_i32_0 = arith.constant 0 : i32
    %c0_i32_1 = arith.constant 0 : i32
    return %c0_i32, %c0_i32_0 : i32, i32
  }
  func.func @transform_5(%arg0: i32) -> (i32, i32) {
    %c0_i32 = arith.constant 0 : i32
    %c0_i32_0 = arith.constant 0 : i32
    %c0_i32_1 = arith.constant 0 : i32
    return %c0_i32, %c0_i32_0 : i32, i32
  }
  func.func @transform_6(%arg0: i32) -> (i32, i32) {
    %c0_i32 = arith.constant 0 : i32
    %c0_i32_0 = arith.constant 0 : i32
    return %arg0, %c0_i32 : i32, i32
  }
  func.func @transform_7(%arg0: i32) -> (i32, i32) {
    %c0_i32 = arith.constant 0 : i32
    %c0_i32_0 = arith.constant 0 : i32
    return %arg0, %c0_i32 : i32, i32
  }
}

</mosaic_0001>

<bundles_post_ra>
// kernel: tpu_custom_call.1
= control target key start
LH: loop header
LB: loop body
LE: loop exit
PB: predicated region body
PF: predicated region fallthrough
CT: control target
= control target key end

     0   :  { %13 = vsyncpa [#allocation3], 0  ;;  %s753_s0 = inlined_call_operand.hbm [shape: f32[4,128], index: 0, kind: input, shape index: {}]   ;;  %s754_s1 = inlined_call_operand.hbm [shape: f32[4,128], index: 1, kind: input, shape index: {}]   ;;  %s755_s2 = inlined_call_operand.hbm [shape: f32[128,128], index: 2, kind: input, shape index: {}]   ;;  %s756_s3 = inlined_call_operand.hbm [shape: f32[128,128], index: 3, kind: input, shape index: {}]   ;;  %s757_s4 = inlined_call_operand.vmem [shape: f32[1,128], index: 4, kind: input, shape index: {}]   ;;  %s758_s5 = inlined_call_operand.vmem [shape: f32[1,128], index: 5, kind: input, shape index: {}]   ;;  %s759_s6 = inlined_call_operand.hbm [shape: f32[4,128], index: 6, kind: output, shape index: {0}]   ;;  %s760_s7 = inlined_call_operand.hbm [shape: f32[4,128], index: 7, kind: output, shape index: {1}]  }
   0x1   :  { %14 = vsyncpa [#allocation6], 0 }
   0x2   :  { %15 = vsyncpa [#allocation9], 0 }
   0x3   :  { %16 = vsyncpa [#allocation4], 0 }
   0x4   :  { %17 = vsyncpa [#allocation12], 0  ;;  %s608_s24 = smov [#allocation5]   ;;  %s609_s26 = smov [#allocation2]  }
   0x5   :  { %s34_s25 = sshll.u32 %s608_s24, 4  ;;  %s24_s27 = sshll.u32 %s609_s26, 4  ;;  %s35_s25 = int_to_ptr.vmem [resolvable:$true] %s34_s25  ;;  %s25_s27 = int_to_ptr.vmem [resolvable:$true] %s24_s27 }
   0x6   :  { %s466_s30 = scalar_lea.hbm %s754_s1, 64 }
   0x7   :  { %p467_p0 = scmp.ne.s32.totalorder %s754_s1, %s466_s30  ;;  %p470_p1 = scmp.lt.u32.totalorder %s466_s30, %s754_s1 }
   0x9   :  { %p472_p2 = pnand %p470_p1, %p467_p0 }
   0xb   :  { %475 = shalt.err (!%p472_p2)
}
   0xc   :  { %s476_s12 = scalar_lea.vmem %s35_s25, 64  ;;  %p481_p4 = scmp.lt.s32.totalorder %s35_s25, %s35_s25 }
   0xd   :  { %p477_p3 = scmp.ne.s32.totalorder %s35_s25, %s476_s12  ;;  %p482_p5 = scmp.lt.s32.totalorder %s476_s12, %s476_s12 }
   0xf   :  { %p483_p6 = por %p482_p5, %p481_p4 }
  0x11   :  { %p484_p7 = pnand %p483_p6, %p477_p3 }
  0x13   :  { %487 = shalt.err (!%p484_p7)
}
  0x14   :  { %37 = dma.hbm_to_vmem [thread:$0]  %s754_s1, 64, %s35_s25, [#allocation6]  }
  0x15   :  { %s488_s17 = scalar_lea.hbm %s753_s0, 64 }
  0x16   :  { %p489_p8 = scmp.ne.s32.totalorder %s753_s0, %s488_s17  ;;  %p492_p9 = scmp.lt.u32.totalorder %s488_s17, %s753_s0 }
  0x18   :  { %p494_p10 = pnand %p492_p9, %p489_p8 }
  0x1a   :  { %497 = shalt.err (!%p494_p10)
}
  0x1b   :  { %s498_s22 = scalar_lea.vmem %s25_s27, 64  ;;  %p503_p12 = scmp.lt.s32.totalorder %s25_s27, %s25_s27 }
  0x1c   :  { %p499_p11 = scmp.ne.s32.totalorder %s25_s27, %s498_s22  ;;  %p504_p13 = scmp.lt.s32.totalorder %s498_s22, %s498_s22 }
  0x1e   :  { %p505_p0 = por %p504_p13, %p503_p12 }
  0x20   :  { %p506_p1 = pnand %p505_p0, %p499_p11 }
  0x22   :  { %509 = shalt.err (!%p506_p1)
}
  0x23   :  { %27 = dma.hbm_to_vmem [thread:$0]  %s753_s0, 64, %s25_s27, [#allocation3]  }
  0x24   :  { %s610_s24 = smov [#allocation7]   ;;  %s510_s29 = scalar_lea.hbm %s755_s2, 2048 }
  0x25   :  { %s43_s25 = sshll.u32 %s610_s24, 4  ;;  %p511_p2 = scmp.ne.s32.totalorder %s755_s2, %s510_s29  ;;  %s44_s25 = int_to_ptr.vmem [resolvable:$true] %s43_s25 }
  0x26   :  { %p514_p3 = scmp.lt.u32.totalorder %s510_s29, %s755_s2 }
  0x28   :  { %p516_p4 = pnand %p514_p3, %p511_p2 }
  0x2a   :  { %519 = shalt.err (!%p516_p4)
}
  0x2b   :  { %s520_s11 = scalar_lea.vmem %s44_s25, 2048  ;;  %p525_p6 = scmp.lt.s32.totalorder %s44_s25, %s44_s25 }
  0x2c   :  { %p521_p5 = scmp.ne.s32.totalorder %s44_s25, %s520_s11  ;;  %p526_p7 = scmp.lt.s32.totalorder %s520_s11, %s520_s11 }
  0x2e   :  { %p527_p8 = por %p526_p7, %p525_p6 }
  0x30   :  { %p528_p9 = pnand %p527_p8, %p521_p5 }
  0x32   :  { %531 = shalt.err (!%p528_p9)
}
  0x33   :  { %s611_s0 = smov 128   ;;  %s612_s27 = smov 8  }
  0x34   :  { %49 = dma.hbm_to_vmem [thread:$0]  %s755_s2, 2048, %s44_s25, [#allocation6], %s611_s0, %s611_s0, %s612_s27  }
  0x35   :  { %s613_s14 = smov [#allocation8]   ;;  %s532_s18 = scalar_lea.hbm %s756_s3, 2048 }
  0x36   :  { %s55_s15 = sshll.u32 %s613_s14, 4  ;;  %p533_p10 = scmp.ne.s32.totalorder %s756_s3, %s532_s18  ;;  %s56_s15 = int_to_ptr.vmem [resolvable:$true] %s55_s15 }
  0x37   :  { %p536_p11 = scmp.lt.u32.totalorder %s532_s18, %s756_s3 }
  0x39   :  { %p538_p12 = pnand %p536_p11, %p533_p10 }
  0x3b   :  { %541 = shalt.err (!%p538_p12)
}
  0x3c   :  { %s542_s1 = scalar_lea.vmem %s56_s15, 2048  ;;  %p547_p0 = scmp.lt.s32.totalorder %s56_s15, %s56_s15 }
  0x3d   :  { %p543_p13 = scmp.ne.s32.totalorder %s56_s15, %s542_s1  ;;  %p548_p1 = scmp.lt.s32.totalorder %s542_s1, %s542_s1 }
  0x3f   :  { %p549_p2 = por %p548_p1, %p547_p0 }
  0x41   :  { %p550_p3 = pnand %p549_p2, %p543_p13 }
  0x43   :  { %553 = shalt.err (!%p550_p3)
}
  0x44   :  { %61 = dma.hbm_to_vmem [thread:$0]  %s756_s3, 2048, %s56_s15, [#allocation9], %s611_s0, %s611_s0, %s612_s27  }
  0x45   :  { %598 = dma.done.wait [#allocation3], 64  }
  0x46   :  { %599 = vsyncadd [#allocation3], 4294967232 }
  0x47   :  { %600 = dma.done.wait [#allocation6], 2112  }
  0x48   :  { %601 = vsyncadd [#allocation6], 4294965184 }
  0x49   :  { %602 = dma.done.wait [#allocation9], 2048  }
  0x4a   :  { %603 = vsyncadd [#allocation9], 4294965248  ;;  %v614_v0 = vmov 0.0|0.0   ;;  %vm615_vm0 = vmmov 0   ;;  %v616_v1 = vmov 0.0   ;;  %v80_v2 = vld [vmem:[#allocation7] sm:$0xff] }
  0x4b   :  { %407 = vmatprep.subr.bf16.mxu0 %v614_v0  ;;  %431 = vmatprep.subr.bf16.mxu1 %v614_v0  ;;  %v81_v3 = vld [vmem:[#allocation7 + $0x8] sm:$0xff]  ;;  %v96_v4 = vld [vmem:[#allocation8] sm:$0xff]  ;;  %v82_v7 = vld [vmem:[#allocation7 + $0x10] sm:$0xff]  ;;  %s617_s28 = smov [#allocation10]   ;;  %s618_s30 = smov [#allocation11]  }
  0x4c   :  { %369 = vmatprep.mubr.msk.f32.mxu0 %vm615_vm0, %v616_v1  ;;  %404 = vmatprep.mubr.msk.f32.mxu1 %vm615_vm0, %v616_v1  ;;  %v408_v5 = vpack.c.bf16 %v81_v3, %v80_v2  ;;  %v97_v6 = vld [vmem:[#allocation8 + $0x8] sm:$0xff]  ;;  %v83_v8 = vld [vmem:[#allocation7 + $0x18] sm:$0xff]  ;;  %v98_v10 = vld [vmem:[#allocation8 + $0x10] sm:$0xff]  ;;  %s276_s29 = sshll.u32 %s617_s28, 4  ;;  %s286_s8 = sshll.u32 %s618_s30, 4  ;;  %s277_s29 = int_to_ptr.vmem [resolvable:$true] %s276_s29  ;;  %s287_s8 = int_to_ptr.vmem [resolvable:$true] %s286_s8 }
  0x4d   :  { %v432_v9 = vpack.c.bf16 %v97_v6, %v96_v4  ;;  %v99_v11 = vld [vmem:[#allocation8 + $0x18] sm:$0xff]  ;;  %v411_v12 = vpack.c.bf16 %v83_v8, %v82_v7  ;;  %v84_v14 = vld [vmem:[#allocation7 + $0x20] sm:$0xff]  ;;  %v85_v15 = vld [vmem:[#allocation7 + $0x28] sm:$0xff]  ;;  %p559_p5 = scmp.lt.s32.totalorder %s277_s29, %s277_s29 }
  0x4e   :  { %409 = vmatpush3.bf16.msra.mxu0 %v408_v5  ;;  %v435_v13 = vpack.c.bf16 %v99_v11, %v98_v10  ;;  %v100_v16 = vld [vmem:[#allocation8 + $0x20] sm:$0xff]  ;;  %v101_v17 = vld [vmem:[#allocation8 + $0x28] sm:$0xff]  ;;  %v414_v18 = vpack.c.bf16 %v85_v15, %v84_v14  ;;  %v86_v20 = vld [vmem:[#allocation7 + $0x30] sm:$0xff] }
  0x4f   :  { %433 = vmatpush3.bf16.msra.mxu1 %v432_v9  ;;  %410 = vmatprep.subr.bf16.mxu0 %v614_v0  ;;  %v438_v19 = vpack.c.bf16 %v101_v17, %v100_v16  ;;  %v87_v21 = vld [vmem:[#allocation7 + $0x38] sm:$0xff]  ;;  %v102_v22 = vld [vmem:[#allocation8 + $0x30] sm:$0xff]  ;;  %v88_v26 = vld [vmem:[#allocation7 + $0x40] sm:$0xff] }
  0x50   :  { %434 = vmatprep.subr.bf16.mxu1 %v614_v0  ;;  %v103_v23 = vld [vmem:[#allocation8 + $0x38] sm:$0xff]  ;;  %v417_v24 = vpack.c.bf16 %v87_v21, %v86_v20  ;;  %v89_v27 = vld [vmem:[#allocation7 + $0x48] sm:$0xff]  ;;  %v104_v28 = vld [vmem:[#allocation8 + $0x40] sm:$0xff] }
  0x51   :  { %v441_v25 = vpack.c.bf16 %v103_v23, %v102_v22  ;;  %v105_v29 = vld [vmem:[#allocation8 + $0x48] sm:$0xff]  ;;  %v420_v30 = vpack.c.bf16 %v89_v27, %v88_v26  ;;  %v90_v32 = vld [vmem:[#allocation7 + $0x50] sm:$0xff]  ;;  %v91_v33 = vld [vmem:[#allocation7 + $0x58] sm:$0xff] }
  0x52   :  { %412 = vmatpush3.bf16.msra.mxu0 %v411_v12  ;;  %v444_v31 = vpack.c.bf16 %v105_v29, %v104_v28  ;;  %v106_v34 = vld [vmem:[#allocation8 + $0x50] sm:$0xff]  ;;  %v107_v35 = vld [vmem:[#allocation8 + $0x58] sm:$0xff]  ;;  %v423_v36 = vpack.c.bf16 %v91_v33, %v90_v32  ;;  %v92_v38 = vld [vmem:[#allocation7 + $0x60] sm:$0xff] }
  0x53   :  { %436 = vmatpush3.bf16.msra.mxu1 %v435_v13  ;;  %413 = vmatprep.subr.bf16.mxu0 %v614_v0  ;;  %v447_v37 = vpack.c.bf16 %v107_v35, %v106_v34  ;;  %v93_v39 = vld [vmem:[#allocation7 + $0x68] sm:$0xff]  ;;  %v108_v40 = vld [vmem:[#allocation8 + $0x60] sm:$0xff]  ;;  %v94_v44 = vld [vmem:[#allocation7 + $0x70] sm:$0xff] }
  0x54   :  { %437 = vmatprep.subr.bf16.mxu1 %v614_v0  ;;  %v109_v41 = vld [vmem:[#allocation8 + $0x68] sm:$0xff]  ;;  %v426_v42 = vpack.c.bf16 %v93_v39, %v92_v38  ;;  %v95_v45 = vld [vmem:[#allocation7 + $0x78] sm:$0xff]  ;;  %v110_v46 = vld [vmem:[#allocation8 + $0x70] sm:$0xff] }
  0x55   :  { %v450_v43 = vpack.c.bf16 %v109_v41, %v108_v40  ;;  %v111_v47 = vld [vmem:[#allocation8 + $0x78] sm:$0xff]  ;;  %v429_v48 = vpack.c.bf16 %v95_v45, %v94_v44 }
  0x56   :  { %415 = vmatpush3.bf16.msra.mxu0 %v414_v18  ;;  %v453_v49 = vpack.c.bf16 %v111_v47, %v110_v46  ;;  %v78_v50 = vld [vmem:[#allocation2] sm:$0xf]  ;;  %v79_v51 = vld [vmem:[#allocation5] sm:$0xf] }
  0x57   :  { %439 = vmatpush3.bf16.msra.mxu1 %v438_v19  ;;  %416 = vmatprep.subr.bf16.mxu0 %v614_v0  ;;  %v301_v52 = vld [vmem:[%s757_s4] ss:$0 sm:$0xff]  ;;  %s554_s4 = scalar_lea.vmem %s277_s29, 64 }
  0x58   :  { %440 = vmatprep.subr.bf16.mxu1 %v614_v0  ;;  %v302_v53 = vld [vmem:[%s758_s5] ss:$0 sm:$0xff]  ;;  %p555_p4 = scmp.ne.s32.totalorder %s277_s29, %s554_s4  ;;  %p560_p6 = scmp.lt.s32.totalorder %s554_s4, %s554_s4 }
  0x5a   :  { %418 = vmatpush3.bf16.msra.mxu0 %v417_v24  ;;  %p561_p7 = por %p560_p6, %p559_p5 }
  0x5b   :  { %442 = vmatpush3.bf16.msra.mxu1 %v441_v25  ;;  %419 = vmatprep.subr.bf16.mxu0 %v614_v0 }
  0x5c   :  { %443 = vmatprep.subr.bf16.mxu1 %v614_v0  ;;  %p562_p8 = pnand %p561_p7, %p555_p4 }
  0x5e   :  { %421 = vmatpush3.bf16.msra.mxu0 %v420_v30 }
  0x5f   :  { %445 = vmatpush3.bf16.msra.mxu1 %v444_v31  ;;  %422 = vmatprep.subr.bf16.mxu0 %v614_v0 }
  0x60   :  { %446 = vmatprep.subr.bf16.mxu1 %v614_v0 }
  0x62   :  { %424 = vmatpush3.bf16.msra.mxu0 %v423_v36 }
  0x63   :  { %448 = vmatpush3.bf16.msra.mxu1 %v447_v37  ;;  %425 = vmatprep.subr.bf16.mxu0 %v614_v0 }
  0x64   :  { %449 = vmatprep.subr.bf16.mxu1 %v614_v0 }
  0x66   :  { %427 = vmatpush3.bf16.msra.mxu0 %v426_v42 }
  0x67   :  { %451 = vmatpush3.bf16.msra.mxu1 %v450_v43  ;;  %428 = vmatprep.subr.bf16.mxu0 %v614_v0 }
  0x68   :  { %452 = vmatprep.subr.bf16.mxu1 %v614_v0 }
  0x6a   :  { %430 = vmatpush3.bf16.msra.mxu0 %v429_v48 }
  0x6b   :  { %454 = vmatpush3.bf16.msra.mxu1 %v453_v49 }
  0x6d   :  { %370 = vmatmul.mubr.f32.vlgmr.msra.gmra.mrb[0].mxu0 %v78_v50 }
  0x6e   :  { %405 = vmatmul.mubr.f32.vlgmr.msra.gmra.mrb[0].mxu1 %v79_v51 }
 0x140   :  { %v185_v54 = vpop.f32.mrb[0].mxu0 }
 0x141   :  { %v186_v55 = vadd.f32 %v301_v52, %v185_v54  ;;  %v264_v56 = vpop.f32.mrb[0].mxu1  ;;  %v371_v57 = vpop.f32.mrb[1].mxu0 }
 0x142   :  { %v265_v58 = vadd.f32 %v302_v53, %v264_v56  ;;  %v406_v59 = vpop.f32.mrb[1].mxu1 }
 0x143   :  { %v189_v60 = vadd.f32 %v186_v55, %v78_v50 }
 0x144   :  { %v268_v61 = vadd.f32 %v265_v58, %v79_v51 }
 0x145   :  { %190 = vst [vmem:[#allocation10] sm:$0xf] %v189_v60 }
 0x146   :  { %269 = vst [vmem:[#allocation11] sm:$0xf] %v268_v61 }
 0x147   :  { %565 = shalt.err (!%p562_p8)
}
 0x148   :  { %s566_s10 = scalar_lea.hbm %s759_s6, 64 }
 0x149   :  { %p567_p9 = scmp.ne.s32.totalorder %s759_s6, %s566_s10  ;;  %p570_p10 = scmp.lt.u32.totalorder %s566_s10, %s759_s6 }
 0x14b   :  { %p572_p11 = pnand %p570_p10, %p567_p9 }
 0x14d   :  { %575 = shalt.err (!%p572_p11)
}
 0x14e   :  { %279 = dma.vmem_to_hbm [thread:$0]  %s277_s29, 64, %s759_s6, [#allocation4]  }
 0x14f   :  { %s576_s15 = scalar_lea.vmem %s287_s8, 64  ;;  %p581_p13 = scmp.lt.s32.totalorder %s287_s8, %s287_s8 }
 0x150   :  { %p577_p12 = scmp.ne.s32.totalorder %s287_s8, %s576_s15  ;;  %p582_p0 = scmp.lt.s32.totalorder %s576_s15, %s576_s15 }
 0x152   :  { %p583_p1 = por %p582_p0, %p581_p13 }
 0x154   :  { %p584_p2 = pnand %p583_p1, %p577_p12 }
 0x156   :  { %587 = shalt.err (!%p584_p2)
}
 0x157   :  { %s588_s18 = scalar_lea.hbm %s760_s7, 64 }
 0x158   :  { %p589_p3 = scmp.ne.s32.totalorder %s760_s7, %s588_s18  ;;  %p592_p4 = scmp.lt.u32.totalorder %s588_s18, %s760_s7 }
 0x15a   :  { %p594_p5 = pnand %p592_p4, %p589_p3 }
 0x15c   :  { %597 = shalt.err (!%p594_p5)
}
 0x15d   :  { %289 = dma.vmem_to_hbm [thread:$0]  %s287_s8, 64, %s760_s7, [#allocation12]  }
 0x15e   :  { %604 = dma.done.wait [#allocation4], 64  }
 0x15f   :  { %605 = vsyncadd [#allocation4], 4294967232 }
 0x160   :  { %606 = dma.done.wait [#allocation12], 64  }
 0x161   :  { %607 = vsyncadd [#allocation12], 4294967232 }
 0x162   :  { %296 = vsyncpa [#allocation3], 1 }
 0x163   :  { %297 = vsyncpa [#allocation6], 1 }
 0x164   :  { %298 = vsyncpa [#allocation9], 1 }
 0x165   :  { %299 = vsyncpa [#allocation4], 1 }
 0x166   :  { %300 = vsyncpa [#allocation12], 1 }

</bundles_post_ra>
